<compile_context>
chip_gen: v7x
topology: tpu7x:2x2x1
jax: 0.10.0
libtpu: 0.0.40
codegen_flags: <defaults>
</compile_context>

<pallas_src>
import functools

import jax
import jax.numpy as jnp
from jax.experimental import pallas as pl
from jax.experimental.pallas import tpu as pltpu

# Module hyperparameters (DeepCausalModel defaults, except `units` picked lane-friendly).
PHI_LAYERS = 2                       # phi_layers
Y_LAYERS = 3                         # y_layers
N_TREATMENTS = 2                     # n_treatments
OUTPUT_DIM = 1                       # output_dim
UNITS = 32                           # units (module default is 20; 32 is sublane-friendly)
FUSED = N_TREATMENTS * UNITS         # fused hidden width (64)
N_OUT = N_TREATMENTS * OUTPUT_DIM    # fused output width (2)

BATCH = 256
TILE_B = 128                         # batch rows per grid step (multiple of 8)


def deep_causal_kernel(x_ref, phi_w_ref, phi_b_ref, h0_w_ref, hk_w_ref, h_b_ref,
                       yo_w_ref, yo_b_ref, o_ref):
    """One batch tile of the treatment_input=None forward pass.

    x_ref:     (TB, UNITS)
    phi_w_ref: (PHI_LAYERS, UNITS, UNITS)    phi_b_ref: (PHI_LAYERS, UNITS)
    h0_w_ref:  (UNITS, FUSED)                -- heads' layer 0, concatenated on out dim
    hk_w_ref:  (Y_LAYERS-1, FUSED, FUSED)    -- block-diagonal fused hidden layers 1..
    h_b_ref:   (Y_LAYERS, FUSED)
    yo_w_ref:  (FUSED, N_OUT)                -- block-diagonal fused output heads
    yo_b_ref:  (1, N_OUT)
    o_ref:     (TB, N_OUT)                   -- reshaped to (B, T, OUT) in the wrapper
    """
    # phi: shared representation MLP (Linear + ReLU) x PHI_LAYERS
    h = x_ref[...]
    phi_b = phi_b_ref[...]
    for l in range(PHI_LAYERS):                       # unrolled at trace time
        h = jnp.dot(h, phi_w_ref[l], preferred_element_type=jnp.float32) + phi_b[l]
        h = jnp.maximum(h, 0.0)

    # fused per-treatment y_hidden MLPs (block-diagonal weights)
    h_b = h_b_ref[...]
    s = jnp.dot(h, h0_w_ref[...], preferred_element_type=jnp.float32) + h_b[0]
    s = jnp.maximum(s, 0.0)
    for l in range(Y_LAYERS - 1):                     # unrolled at trace time
        s = jnp.dot(s, hk_w_ref[l], preferred_element_type=jnp.float32) + h_b[l + 1]
        s = jnp.maximum(s, 0.0)

    # fused y_output heads -> (TB, N_OUT)
    y = jnp.dot(s, yo_w_ref[...], preferred_element_type=jnp.float32) + yo_b_ref[...]
    o_ref[...] = y.astype(o_ref.dtype)


def fuse_head_params(yh_w, yh_b, yo_w, yo_b):
    """Wrapper-side, one-time fusion of the per-treatment heads."""
    # yh_w: (T, L, U, U)  yh_b: (T, L, U)  yo_w: (T, U, OUT)  yo_b: (T, OUT)
    h0_w = jnp.concatenate([yh_w[t, 0] for t in range(N_TREATMENTS)], axis=1)       # (U, F)
    hk_w = jnp.stack(
        [jax.scipy.linalg.block_diag(*[yh_w[t, l] for t in range(N_TREATMENTS)])
         for l in range(1, Y_LAYERS)], axis=0)                                       # (L-1, F, F)
    h_b = jnp.stack(
        [jnp.concatenate([yh_b[t, l] for t in range(N_TREATMENTS)], axis=0)
         for l in range(Y_LAYERS)], axis=0)                                          # (L, F)
    yo_w_f = jax.scipy.linalg.block_diag(*[yo_w[t] for t in range(N_TREATMENTS)])    # (F, N_OUT)
    yo_b_f = jnp.concatenate([yo_b[t] for t in range(N_TREATMENTS)], axis=0)[None]   # (1, N_OUT)
    return h0_w, hk_w, h_b, yo_w_f, yo_b_f


def _cost_estimate(batch, dtype_bytes=4):
    macs = batch * (PHI_LAYERS * UNITS * UNITS
                    + UNITS * FUSED
                    + (Y_LAYERS - 1) * FUSED * FUSED
                    + FUSED * N_OUT)
    weight_elems = (PHI_LAYERS * UNITS * UNITS + PHI_LAYERS * UNITS
                    + UNITS * FUSED + (Y_LAYERS - 1) * FUSED * FUSED + Y_LAYERS * FUSED
                    + FUSED * N_OUT + N_OUT)
    bytes_accessed = dtype_bytes * (batch * UNITS + weight_elems + batch * N_OUT)
    return pl.CostEstimate(flops=2 * macs, transcendentals=0,
                           bytes_accessed=bytes_accessed)


@functools.partial(jax.jit, static_argnames=("tile_b",))
def deep_causal_forward(x, phi_w, phi_b, h0_w, hk_w, h_b, yo_w_f, yo_b_f, *, tile_b=TILE_B):
    batch = x.shape[0]
    tb = min(tile_b, batch)
    assert batch % tb == 0, "batch must be a multiple of the batch tile"
    assert tb % 8 == 0, "batch tile must be a multiple of 8 (sublane)"
    grid = (batch // tb,)

    def full_spec(a):
        # Full-array block; block index never changes -> weight stays VMEM-resident.
        return pl.BlockSpec(a.shape, lambda i, _nd=a.ndim: (0,) * _nd)

    out2d = pl.pallas_call(
        deep_causal_kernel,
        out_shape=jax.ShapeDtypeStruct((batch, N_OUT), jnp.float32),
        grid=grid,
        in_specs=[
            pl.BlockSpec((tb, UNITS), lambda i: (i, 0)),   # x: tiled over batch
            full_spec(phi_w), full_spec(phi_b),
            full_spec(h0_w), full_spec(hk_w), full_spec(h_b),
            full_spec(yo_w_f), full_spec(yo_b_f),
        ],
        out_specs=pl.BlockSpec((tb, N_OUT), lambda i: (i, 0)),
        compiler_params=pltpu.CompilerParams(dimension_semantics=("parallel",)),
        cost_estimate=_cost_estimate(batch),
    )(x, phi_w, phi_b, h0_w, hk_w, h_b, yo_w_f, yo_b_f)

    # torch.stack(x_streams, dim=1) == contiguous (B, T*OUT) slab reshaped in the wrapper.
    return out2d.reshape(batch, N_TREATMENTS, OUTPUT_DIM)


def reference_forward(x, phi_w, phi_b, yh_w, yh_b, yo_w, yo_b):
    """Pure-JAX reference mirroring the PyTorch forward (treatment_input=None)."""
    h = x
    for l in range(PHI_LAYERS):
        h = jnp.maximum(h @ phi_w[l] + phi_b[l], 0.0)
    outs = []
    for t in range(N_TREATMENTS):
        s = h
        for l in range(Y_LAYERS):
            s = jnp.maximum(s @ yh_w[t, l] + yh_b[t, l], 0.0)
        outs.append(s @ yo_w[t] + yo_b[t])
    return jnp.stack(outs, axis=1)


def init_params(key):
    ks = jax.random.split(key, 6)
    scale = 0.1
    phi_w = scale * jax.random.normal(ks[0], (PHI_LAYERS, UNITS, UNITS), jnp.float32)
    phi_b = scale * jax.random.normal(ks[1], (PHI_LAYERS, UNITS), jnp.float32)
    yh_w = scale * jax.random.normal(ks[2], (N_TREATMENTS, Y_LAYERS, UNITS, UNITS), jnp.float32)
    yh_b = scale * jax.random.normal(ks[3], (N_TREATMENTS, Y_LAYERS, UNITS), jnp.float32)
    yo_w = scale * jax.random.normal(ks[4], (N_TREATMENTS, UNITS, OUTPUT_DIM), jnp.float32)
    yo_b = scale * jax.random.normal(ks[5], (N_TREATMENTS, OUTPUT_DIM), jnp.float32)
    return phi_w, phi_b, yh_w, yh_b, yo_w, yo_b


if __name__ == "__main__":
    key = jax.random.PRNGKey(0)
    k_x, k_p = jax.random.split(key)
    x = jax.random.normal(k_x, (BATCH, UNITS), jnp.float32)
    phi_w, phi_b, yh_w, yh_b, yo_w, yo_b = init_params(k_p)

    # One-time wrapper-side head fusion (concatenated / block-diagonal weights).
    h0_w, hk_w, h_b, yo_w_f, yo_b_f = fuse_head_params(yh_w, yh_b, yo_w, yo_b)

    out = deep_causal_forward(x, phi_w, phi_b, h0_w, hk_w, h_b, yo_w_f, yo_b_f)
    out = jax.block_until_ready(out)

    ref = reference_forward(x, phi_w, phi_b, yh_w, yh_b, yo_w, yo_b)
    assert out.shape == (BATCH, N_TREATMENTS, OUTPUT_DIM), out.shape
    assert jnp.allclose(out, ref, atol=1e-5, rtol=1e-5), "kernel/reference mismatch"

    print("KERNEL_OK")
</pallas_src>

<mosaic_0001>
module attributes {stable_mosaic.version = 11 : i64} {
  func.func @deep_causal_kernel(%arg0: i32, %arg1: memref<128x32xf32, #tpu.memory_space<vmem>>, %arg2: memref<2x32x32xf32, #tpu.memory_space<vmem>>, %arg3: memref<2x32xf32, #tpu.memory_space<vmem>>, %arg4: memref<32x64xf32, #tpu.memory_space<vmem>>, %arg5: memref<2x64x64xf32, #tpu.memory_space<vmem>>, %arg6: memref<3x64xf32, #tpu.memory_space<vmem>>, %arg7: memref<64x2xf32, #tpu.memory_space<vmem>>, %arg8: memref<1x2xf32, #tpu.memory_space<vmem>>, %arg9: memref<128x2xf32, #tpu.memory_space<vmem>>) attributes {dimension_semantics = [#tpu.dimension_semantics<parallel>], iteration_bounds = array<i64: 2>, scalar_prefetch = 0 : i64, scratch_operands = 0 : i64, tpu.core_type = #tpu.core_type<tc>, window_params = [{transform_indices = @transform_0, window_bounds = array<i64: 128, 32>}, {pipeline_mode = #tpu.pipeline_mode<synchronous>, transform_indices = @transform_1, window_bounds = array<i64: 2, 32, 32>}, {pipeline_mode = #tpu.pipeline_mode<synchronous>, transform_indices = @transform_2, window_bounds = array<i64: 2, 32>}, {pipeline_mode = #tpu.pipeline_mode<synchronous>, transform_indices = @transform_3, window_bounds = array<i64: 32, 64>}, {pipeline_mode = #tpu.pipeline_mode<synchronous>, transform_indices = @transform_4, window_bounds = array<i64: 2, 64, 64>}, {pipeline_mode = #tpu.pipeline_mode<synchronous>, transform_indices = @transform_5, window_bounds = array<i64: 3, 64>}, {pipeline_mode = #tpu.pipeline_mode<synchronous>, transform_indices = @transform_6, window_bounds = array<i64: 64, 2>}, {pipeline_mode = #tpu.pipeline_mode<synchronous>, transform_indices = @transform_7, window_bounds = array<i64: 1, 2>}, {transform_indices = @transform_8, window_bounds = array<i64: 128, 2>}]} {
    %c0 = arith.constant 0 : index
    %c0_0 = arith.constant 0 : index
    %0 = vector.load %arg1[%c0, %c0_0] : memref<128x32xf32, #tpu.memory_space<vmem>>, vector<128x32xf32>
    %c0_1 = arith.constant 0 : index
    %c0_2 = arith.constant 0 : index
    %1 = vector.load %arg3[%c0_1, %c0_2] : memref<2x32xf32, #tpu.memory_space<vmem>>, vector<2x32xf32>
    %c0_3 = arith.constant 0 : index
    %c0_4 = arith.constant 0 : index
    %c0_5 = arith.constant 0 : index
    %2 = vector.load %arg2[%c0_3, %c0_4, %c0_5] : memref<2x32x32xf32, #tpu.memory_space<vmem>>, vector<1x32x32xf32>
    %3 = vector.shape_cast %2 : vector<1x32x32xf32> to vector<32x32xf32>
    %cst = arith.constant dense<0.000000e+00> : vector<128x32xf32>
    %4 = tpu.matmul %0, %3, %cst {dimension_numbers = #tpu.dot_dimension_numbers<[1], [0], [0], [1], [0, 0, 1, 1], [], []>} : vector<128x32xf32>, vector<32x32xf32>, vector<128x32xf32> -> vector<128x32xf32>
    %5 = vector.extract_strided_slice %1 {offsets = [0, 0], sizes = [1, 32], strides = [1, 1]} : vector<2x32xf32> to vector<1x32xf32>
    %6 = vector.shape_cast %5 : vector<1x32xf32> to vector<32xf32>
    %7 = vector.shape_cast %6 : vector<32xf32> to vector<1x32xf32>
    %8 = vector.broadcast %7 : vector<1x32xf32> to vector<128x32xf32>
    %9 = arith.addf %4, %8 : vector<128x32xf32>
    %cst_6 = arith.constant 0.000000e+00 : f32
    %10 = vector.broadcast %cst_6 : f32 to vector<128x32xf32>
    %11 = arith.maximumf %9, %10 : vector<128x32xf32>
    %c1 = arith.constant 1 : index
    %c0_7 = arith.constant 0 : index
    %c0_8 = arith.constant 0 : index
    %12 = vector.load %arg2[%c1, %c0_7, %c0_8] : memref<2x32x32xf32, #tpu.memory_space<vmem>>, vector<1x32x32xf32>
    %13 = vector.shape_cast %12 : vector<1x32x32xf32> to vector<32x32xf32>
    %cst_9 = arith.constant dense<0.000000e+00> : vector<128x32xf32>
    %14 = tpu.matmul %11, %13, %cst_9 {dimension_numbers = #tpu.dot_dimension_numbers<[1], [0], [0], [1], [0, 0, 1, 1], [], []>} : vector<128x32xf32>, vector<32x32xf32>, vector<128x32xf32> -> vector<128x32xf32>
    %15 = vector.extract_strided_slice %1 {offsets = [1, 0], sizes = [1, 32], strides = [1, 1]} : vector<2x32xf32> to vector<1x32xf32>
    %16 = vector.shape_cast %15 : vector<1x32xf32> to vector<32xf32>
    %17 = vector.shape_cast %16 : vector<32xf32> to vector<1x32xf32>
    %18 = vector.broadcast %17 : vector<1x32xf32> to vector<128x32xf32>
    %19 = arith.addf %14, %18 : vector<128x32xf32>
    %cst_10 = arith.constant 0.000000e+00 : f32
    %20 = vector.broadcast %cst_10 : f32 to vector<128x32xf32>
    %21 = arith.maximumf %19, %20 : vector<128x32xf32>
    %c0_11 = arith.constant 0 : index
    %c0_12 = arith.constant 0 : index
    %22 = vector.load %arg6[%c0_11, %c0_12] : memref<3x64xf32, #tpu.memory_space<vmem>>, vector<3x64xf32>
    %c0_13 = arith.constant 0 : index
    %c0_14 = arith.constant 0 : index
    %23 = vector.load %arg4[%c0_13, %c0_14] : memref<32x64xf32, #tpu.memory_space<vmem>>, vector<32x64xf32>
    %cst_15 = arith.constant dense<0.000000e+00> : vector<128x64xf32>
    %24 = tpu.matmul %21, %23, %cst_15 {dimension_numbers = #tpu.dot_dimension_numbers<[1], [0], [0], [1], [0, 0, 1, 1], [], []>} : vector<128x32xf32>, vector<32x64xf32>, vector<128x64xf32> -> vector<128x64xf32>
    %25 = vector.extract_strided_slice %22 {offsets = [0, 0], sizes = [1, 64], strides = [1, 1]} : vector<3x64xf32> to vector<1x64xf32>
    %26 = vector.shape_cast %25 : vector<1x64xf32> to vector<64xf32>
    %27 = vector.shape_cast %26 : vector<64xf32> to vector<1x64xf32>
    %28 = vector.broadcast %27 : vector<1x64xf32> to vector<128x64xf32>
    %29 = arith.addf %24, %28 : vector<128x64xf32>
    %cst_16 = arith.constant 0.000000e+00 : f32
    %30 = vector.broadcast %cst_16 : f32 to vector<128x64xf32>
    %31 = arith.maximumf %29, %30 : vector<128x64xf32>
    %c0_17 = arith.constant 0 : index
    %c0_18 = arith.constant 0 : index
    %c0_19 = arith.constant 0 : index
    %32 = vector.load %arg5[%c0_17, %c0_18, %c0_19] : memref<2x64x64xf32, #tpu.memory_space<vmem>>, vector<1x64x64xf32>
    %33 = vector.shape_cast %32 : vector<1x64x64xf32> to vector<64x64xf32>
    %cst_20 = arith.constant dense<0.000000e+00> : vector<128x64xf32>
    %34 = tpu.matmul %31, %33, %cst_20 {dimension_numbers = #tpu.dot_dimension_numbers<[1], [0], [0], [1], [0, 0, 1, 1], [], []>} : vector<128x64xf32>, vector<64x64xf32>, vector<128x64xf32> -> vector<128x64xf32>
    %35 = vector.extract_strided_slice %22 {offsets = [1, 0], sizes = [1, 64], strides = [1, 1]} : vector<3x64xf32> to vector<1x64xf32>
    %36 = vector.shape_cast %35 : vector<1x64xf32> to vector<64xf32>
    %37 = vector.shape_cast %36 : vector<64xf32> to vector<1x64xf32>
    %38 = vector.broadcast %37 : vector<1x64xf32> to vector<128x64xf32>
    %39 = arith.addf %34, %38 : vector<128x64xf32>
    %cst_21 = arith.constant 0.000000e+00 : f32
    %40 = vector.broadcast %cst_21 : f32 to vector<128x64xf32>
    %41 = arith.maximumf %39, %40 : vector<128x64xf32>
    %c1_22 = arith.constant 1 : index
    %c0_23 = arith.constant 0 : index
    %c0_24 = arith.constant 0 : index
    %42 = vector.load %arg5[%c1_22, %c0_23, %c0_24] : memref<2x64x64xf32, #tpu.memory_space<vmem>>, vector<1x64x64xf32>
    %43 = vector.shape_cast %42 : vector<1x64x64xf32> to vector<64x64xf32>
    %cst_25 = arith.constant dense<0.000000e+00> : vector<128x64xf32>
    %44 = tpu.matmul %41, %43, %cst_25 {dimension_numbers = #tpu.dot_dimension_numbers<[1], [0], [0], [1], [0, 0, 1, 1], [], []>} : vector<128x64xf32>, vector<64x64xf32>, vector<128x64xf32> -> vector<128x64xf32>
    %45 = vector.extract_strided_slice %22 {offsets = [2, 0], sizes = [1, 64], strides = [1, 1]} : vector<3x64xf32> to vector<1x64xf32>
    %46 = vector.shape_cast %45 : vector<1x64xf32> to vector<64xf32>
    %47 = vector.shape_cast %46 : vector<64xf32> to vector<1x64xf32>
    %48 = vector.broadcast %47 : vector<1x64xf32> to vector<128x64xf32>
    %49 = arith.addf %44, %48 : vector<128x64xf32>
    %cst_26 = arith.constant 0.000000e+00 : f32
    %50 = vector.broadcast %cst_26 : f32 to vector<128x64xf32>
    %51 = arith.maximumf %49, %50 : vector<128x64xf32>
    %c0_27 = arith.constant 0 : index
    %c0_28 = arith.constant 0 : index
    %52 = vector.load %arg7[%c0_27, %c0_28] : memref<64x2xf32, #tpu.memory_space<vmem>>, vector<64x2xf32>
    %cst_29 = arith.constant dense<0.000000e+00> : vector<128x2xf32>
    %53 = tpu.matmul %51, %52, %cst_29 {dimension_numbers = #tpu.dot_dimension_numbers<[1], [0], [0], [1], [0, 0, 1, 1], [], []>} : vector<128x64xf32>, vector<64x2xf32>, vector<128x2xf32> -> vector<128x2xf32>
    %c0_30 = arith.constant 0 : index
    %c0_31 = arith.constant 0 : index
    %54 = vector.load %arg8[%c0_30, %c0_31] : memref<1x2xf32, #tpu.memory_space<vmem>>, vector<1x2xf32>
    %55 = vector.broadcast %54 : vector<1x2xf32> to vector<128x2xf32>
    %56 = arith.addf %53, %55 : vector<128x2xf32>
    %c0_32 = arith.constant 0 : index
    %c0_33 = arith.constant 0 : index
    %57 = vector.load %arg9[%c0_32, %c0_33] : memref<128x2xf32, #tpu.memory_space<vmem>>, vector<128x2xf32>
    tpu.vector_store %arg9[%c0_32, %c0_33], %56 {strides = array<i32>} : memref<128x2xf32, #tpu.memory_space<vmem>>, vector<128x2xf32>,
    return
  }
  func.func @transform_0(%arg0: i32) -> (i32, i32) {
    %c0_i32 = arith.constant 0 : i32
    %c0_i32_0 = arith.constant 0 : i32
    return %arg0, %c0_i32 : i32, i32
  }
  func.func @transform_1(%arg0: i32) -> (i32, i32, i32) {
    %c0_i32 = arith.constant 0 : i32
    %c0_i32_0 = arith.constant 0 : i32
    %c0_i32_1 = arith.constant 0 : i32
    %c0_i32_2 = arith.constant 0 : i32
    return %c0_i32, %c0_i32_0, %c0_i32_1 : i32, i32, i32
  }
  func.func @transform_2(%arg0: i32) -> (i32, i32) {
    %c0_i32 = arith.constant 0 : i32
    %c0_i32_0 = arith.constant 0 : i32
    %c0_i32_1 = arith.constant 0 : i32
    return %c0_i32, %c0_i32_0 : i32, i32
  }
  func.func @transform_3(%arg0: i32) -> (i32, i32) {
    %c0_i32 = arith.constant 0 : i32
    %c0_i32_0 = arith.constant 0 : i32
    %c0_i32_1 = arith.constant 0 : i32
    return %c0_i32, %c0_i32_0 : i32, i32
  }
  func.func @transform_4(%arg0: i32) -> (i32, i32, i32) {
    %c0_i32 = arith.constant 0 : i32
    %c0_i32_0 = arith.constant 0 : i32
    %c0_i32_1 = arith.constant 0 : i32
    %c0_i32_2 = arith.constant 0 : i32
    return %c0_i32, %c0_i32_0, %c0_i32_1 : i32, i32, i32
  }
  func.func @transform_5(%arg0: i32) -> (i32, i32) {
    %c0_i32 = arith.constant 0 : i32
    %c0_i32_0 = arith.constant 0 : i32
    %c0_i32_1 = arith.constant 0 : i32
    return %c0_i32, %c0_i32_0 : i32, i32
  }
  func.func @transform_6(%arg0: i32) -> (i32, i32) {
    %c0_i32 = arith.constant 0 : i32
    %c0_i32_0 = arith.constant 0 : i32
    %c0_i32_1 = arith.constant 0 : i32
    return %c0_i32, %c0_i32_0 : i32, i32
  }
  func.func @transform_7(%arg0: i32) -> (i32, i32) {
    %c0_i32 = arith.constant 0 : i32
    %c0_i32_0 = arith.constant 0 : i32
    %c0_i32_1 = arith.constant 0 : i32
    return %c0_i32, %c0_i32_0 : i32, i32
  }
  func.func @transform_8(%arg0: i32) -> (i32, i32) {
    %c0_i32 = arith.constant 0 : i32
    %c0_i32_0 = arith.constant 0 : i32
    return %arg0, %c0_i32 : i32, i32
  }
}

</mosaic_0001>

<bundles_post_ra>
// kernel: deep_causal_forward.1
= control target key start
LH: loop header
LB: loop body
LE: loop exit
PB: predicated region body
PF: predicated region fallthrough
CT: control target
= control target key end

     0   :  { %s2306_s27 = smov 0   ;;  %s2617_s0 = inlined_call_operand.vmem [shape: f32[256,32], index: 0, kind: input, shape index: {}]   ;;  %s2618_s1 = inlined_call_operand.vmem [shape: f32[2,32,32], index: 1, kind: input, shape index: {}]   ;;  %s2619_s2 = inlined_call_operand.vmem [shape: f32[2,32], index: 2, kind: input, shape index: {}]   ;;  %s2620_s3 = inlined_call_operand.vmem [shape: f32[32,64], index: 3, kind: input, shape index: {}]   ;;  %s2621_s4 = inlined_call_operand.vmem [shape: f32[2,64,64], index: 4, kind: input, shape index: {}]   ;;  %s2622_s5 = inlined_call_operand.vmem [shape: f32[3,64], index: 5, kind: input, shape index: {}]   ;;  %s2623_s6 = inlined_call_operand.vmem [shape: f32[64,2], index: 6, kind: input, shape index: {}]   ;;  %s2624_s7 = inlined_call_operand.vmem [shape: f32[1,2], index: 7, kind: input, shape index: {}]   ;;  %s2625_s8 = inlined_call_operand.vmem [shape: f32[256,2], index: 8, kind: output, shape index: {}]  }
   0x1 LB: > { %s1705_s28 = sadd.s32 4294967295, %s2259_s27   ;;  %p1709_p0 = scmp.ge.s32.totalorder %s2259_s27, 1  ;;  %s2259_s27 = sphi %s2306_s27, %s18_s27  }
   0x2   : > { %p263_p1 = scmp.lt.s32.totalorder %s2259_s27, 3 }
   0x4   : > { %p264_p2 = pnand %p1709_p0, %p263_p1 }
   0x5   : > { %v326_v0 = vld [vmem:[%s2618_s1] sm:$0xff] (!%p264_p2)  ;;  %v327_v1 = vld [vmem:[%s2618_s1 + $0x8] sm:$0xff] (!%p264_p2)  ;;  %v328_v2 = vld [vmem:[%s2618_s1 + $0x10] sm:$0xff] (!%p264_p2)  ;;  %s1710_s13 = sshll.u32 (!%p264_p2), %s1705_s28, 4  ;;  %vm334_vm0 = vcmask (!%p264_p2), 261120   ;;  %v330_v34 = vlaneseq (!%p264_p2)  ;;  %vm992_vm1 = vcmask (!%p264_p2), 523264  }
   0x6   : > { %267 = sbr.rel (%p264_p2) target bundleno = 1352 (0x548), region = 52  ;;  %v2173_v3 = vpack.c.bf16 (!%p264_p2), %v327_v1, %v326_v0  ;;  %v329_v4 = vld [vmem:[%s2618_s1 + $0x18] sm:$0xff] (!%p264_p2)  ;;  %p298_p3 = scmp.lt.s32.totalorder (!%p264_p2), %s1710_s13, 31  ;;  %v1730_v5 = vld [vmem:[%s2618_s1 + $0x20] sm:$0xff] (!%p264_p2)  ;;  %v1731_v6 = vld [vmem:[%s2618_s1 + $0x28] sm:$0xff] (!%p264_p2)  ;;  %vm1632_vm2 = vcmask (!%p264_p2), 15360  }
   0x7   : > { %v2177_v7 = vpack.c.bf16 (!%p264_p2), %v329_v4, %v328_v2  ;;  %v2181_v8 = vpack.c.bf16 (!%p264_p2), %v1731_v6, %v1730_v5  ;;  %v1732_v25 = vld [vmem:[%s2618_s1 + $0x30] sm:$0xff] (!%p264_p2)  ;;  %v1733_v26 = vld [vmem:[%s2618_s1 + $0x38] sm:$0xff] (!%p264_p2)  ;;  %v763_v28 = vld [vmem:[%s2620_s3] sm:$0xff] (!%p264_p2)  ;;  %v2392_v35 = vshrl.u32 (!%p264_p2), %v330_v34, 7 }
   0x8   : > { %2174 = vmatprep.subr.bf16.mxu0 (!%p264_p2), %v2173_v3  ;;  %v2185_v27 = vpack.c.bf16 (!%p264_p2), %v1733_v26, %v1732_v25  ;;  %v764_v29 = vld [vmem:[%s2620_s3 + $0x8] sm:$0xff] (!%p264_p2)  ;;  %v765_v30 = vld [vmem:[%s2620_s3 + $0x10] sm:$0xff] (!%p264_p2)  ;;  %v766_v32 = vld [vmem:[%s2620_s3 + $0x18] sm:$0xff] (!%p264_p2) }
   0x9   : > { %2176 = vmatpush3.bf16.msra.mxu0 (!%p264_p2), %v2173_v3  ;;  %2182 = vmatprep.subr.bf16.mxu1 (!%p264_p2), %v2181_v8  ;;  %v2189_v31 = vpack.c.bf16 (!%p264_p2), %v764_v29, %v763_v28  ;;  %v2193_v33 = vpack.c.bf16 (!%p264_p2), %v766_v32, %v765_v30  ;;  %v332_v36 = vsub.s32 (!%p264_p2), 0, %v2392_v35  ;;  %v2398_v37 = vld [vmem:[%s2619_s2] sm:$0x3] (!%p264_p2)  ;;  %v982_v25 = vld [vmem:[%s2621_s4 + $0x10] sm:$0xff] (!%p264_p2)  ;;  %v985_v30 = vld [vmem:[%s2621_s4 + $0x28] sm:$0xff] (!%p264_p2) }
   0xa   : > { %2178 = vmatprep.subr.bf16.mxu0 (!%p264_p2), %v2177_v7  ;;  %2184 = vmatpush3.bf16.msra.mxu1 (!%p264_p2), %v2181_v8  ;;  %v984_v29 = vld [vmem:[%s2621_s4 + $0x20] sm:$0xff] (!%p264_p2)  ;;  %v986_v32 = vld [vmem:[%s2621_s4 + $0x30] sm:$0xff] (!%p264_p2) }
   0xb   : > { %2186 = vmatprep.subr.bf16.mxu1 (!%p264_p2), %v2185_v27  ;;  %v333_v38 = vrot.slane (!%p264_p2), %v2398_v37, %v332_v36 }
   0xd   : > { %s2627_s13 = smov (!%p298_p3, %s1710_s13), 31  ;;  %2180 = vmatpush3.bf16.msra.mxu0 %v2177_v7 }
   0xe   : > { %s1711_s20 = sshll.u32 %s2627_s13, 3  ;;  %2188 = vmatpush3.bf16.msra.mxu1 %v2185_v27  ;;  %2190 = vmatprep.subr.bf16.mxu0 %v2189_v31  ;;  %v983_v27 = vld [vmem:[%s2621_s4 + $0x18] sm:$0xff] }
   0xf   : > { %s2340_s23 = scalar_lea.vmem %s2617_s0, %s1711_s20  ;;  %v2201_v28 = vpack.c.bf16 %v983_v27, %v982_v25  ;;  %v1784_v25 = vld [vmem:[%s2621_s4 + $0x50] sm:$0xff]  ;;  %v1785_v27 = vld [vmem:[%s2621_s4 + $0x58] sm:$0xff]  ;;  %s2580_s15 = scalar_lea.vmem %s2625_s8, %s1711_s20 }
  0x10   : > { %v309_v9 = vld [vmem:[%s2340_s23] sm:$0xff]  ;;  %v310_v10 = vld [vmem:[%s2340_s23 + $0x8] sm:$0xff]  ;;  %v311_v11 = vld [vmem:[%s2340_s23 + $0x10] sm:$0xff] }
  0x11   : > { %1965 = vmatprep.mubr.msk.f32.mxu0 %vm334_vm0, %v309_v9  ;;  %v312_v12 = vld [vmem:[%s2340_s23 + $0x18] sm:$0xff]  ;;  %v313_v13 = vld [vmem:[%s2340_s23 + $0x20] sm:$0xff]  ;;  %v314_v14 = vld [vmem:[%s2340_s23 + $0x28] sm:$0xff] }
  0x12   : > { %1966 = vmatmul.mubr.msk.f32.vlgmr.msra.gmra.mrb[0].mxu0 %vm334_vm0, %v310_v10  ;;  %v315_v15 = vld [vmem:[%s2340_s23 + $0x30] sm:$0xff]  ;;  %v316_v16 = vld [vmem:[%s2340_s23 + $0x38] sm:$0xff]  ;;  %v317_v17 = vld [vmem:[%s2340_s23 + $0x40] sm:$0xff] }
  0x13   : > { %1968 = vmatprep.mubr.msk.f32.mxu0 %vm334_vm0, %v311_v11  ;;  %v318_v18 = vld [vmem:[%s2340_s23 + $0x48] sm:$0xff]  ;;  %v319_v19 = vld [vmem:[%s2340_s23 + $0x50] sm:$0xff]  ;;  %v320_v20 = vld [vmem:[%s2340_s23 + $0x58] sm:$0xff]  ;;  %2192 = vmatpush3.bf16.msra.mxu0 %v2189_v31  ;;  %v2205_v31 = vpack.c.bf16 %v985_v30, %v984_v29 }
  0x14   : > { %v321_v21 = vld [vmem:[%s2340_s23 + $0x60] sm:$0xff]  ;;  %v322_v22 = vld [vmem:[%s2340_s23 + $0x68] sm:$0xff]  ;;  %v323_v23 = vld [vmem:[%s2340_s23 + $0x70] sm:$0xff]  ;;  %2194 = vmatprep.subr.bf16.mxu0 %v2193_v33 }
  0x15   : > { %v324_v24 = vld [vmem:[%s2340_s23 + $0x78] sm:$0xff]  ;;  %v1786_v29 = vld [vmem:[%s2621_s4 + $0x60] sm:$0xff]  ;;  %v1787_v30 = vld [vmem:[%s2621_s4 + $0x68] sm:$0xff] }
  0x16   : > { %1969 = vmatmul.mubr.msk.f32.gmra.mrb[2].mxu0 %vm334_vm0, %v312_v12 }
  0x17   : > { %1971 = vmatprep.mubr.msk.f32.mxu0 %vm334_vm0, %v313_v13  ;;  %2196 = vmatpush3.bf16.msra.mxu0 %v2193_v33  ;;  %v987_v33 = vld [vmem:[%s2621_s4 + $0x38] sm:$0xff] }
  0x18   : > { %v2209_v34 = vpack.c.bf16 %v987_v33, %v986_v32  ;;  %v1788_v32 = vld [vmem:[%s2621_s4 + $0x70] sm:$0xff]  ;;  %v1789_v33 = vld [vmem:[%s2621_s4 + $0x78] sm:$0xff] }
  0x1a   : > { %1972 = vmatmul.mubr.msk.f32.gmra.mrb[4].mxu0 %vm334_vm0, %v314_v14 }
  0x1b   : > { %1974 = vmatprep.mubr.msk.f32.mxu0 %vm334_vm0, %v315_v15 }
  0x1e   : > { %1975 = vmatmul.mubr.msk.f32.gmra.mrb[6].mxu0 %vm334_vm0, %v316_v16 }
  0x1f   : > { %1977 = vmatprep.mubr.msk.f32.mxu0 %vm334_vm0, %v317_v17 }
  0x22   : > { %1978 = vmatmul.mubr.msk.f32.gmra.mrb[8].mxu0 %vm334_vm0, %v318_v18 }
  0x23   : > { %1980 = vmatprep.mubr.msk.f32.mxu0 %vm334_vm0, %v319_v19 }
  0x26   : > { %1981 = vmatmul.mubr.msk.f32.gmra.mrb[10].mxu0 %vm334_vm0, %v320_v20 }
  0x27   : > { %1983 = vmatprep.mubr.msk.f32.mxu0 %vm334_vm0, %v321_v21 }
  0x2a   : > { %1984 = vmatmul.mubr.msk.f32.gmra.mrb[12].mxu0 %vm334_vm0, %v322_v22 }
  0x2b   : > { %1986 = vmatprep.mubr.msk.f32.mxu0 %vm334_vm0, %v323_v23  ;;  %v980_v23 = vld [vmem:[%s2621_s4] sm:$0xff] }
  0x2e   : > { %1987 = vmatmul.mubr.msk.f32.gmra.mrb[14].mxu0 %vm334_vm0, %v324_v24  ;;  %v981_v24 = vld [vmem:[%s2621_s4 + $0x8] sm:$0xff] }
  0x2f   : > { %v2197_v26 = vpack.c.bf16 %v981_v24, %v980_v23  ;;  %v1782_v23 = vld [vmem:[%s2621_s4 + $0x40] sm:$0xff]  ;;  %v1783_v24 = vld [vmem:[%s2621_s4 + $0x48] sm:$0xff] }
  0x31   : > { %2198 = vmatprep.subr.bf16.mxu1 %v2197_v26 }
  0xe5   : > { %v1967_v39 = vpop.f32.mrb[0].mxu0 }
  0xe6   : > { %v455_v40 = vadd.f32 %v1967_v39, %v333_v38  ;;  %v449_v41 = vpop.f32.mrb[1].mxu0 }
  0xe7   : > { %v450_v42 = vadd.f32 %v449_v41, %v333_v38 }
  0xe8   : > { %v529_v45 = vmax.f32 %v455_v40, 0.0 }
  0xe9   : > { %v528_v43 = vmax.f32 %v450_v42, 0.0  ;;  %v1970_v44 = vpop.f32.mrb[2].mxu0 }
  0xea   : > { %v465_v46 = vadd.f32 %v1970_v44, %v333_v38  ;;  %v459_v47 = vpop.f32.mrb[3].mxu0 }
  0xeb   : > { %v460_v48 = vadd.f32 %v459_v47, %v333_v38  ;;  %1997 = vmatprep.mubr.msk.f32.mxu1 %vm334_vm0, %v528_v43 }
  0xec   : > { %1998 = vmatmul.mubr.msk.f32.vlgmr.msra.gmra.mrb[0].mxu1 %vm334_vm0, %v529_v45  ;;  %v531_v51 = vmax.f32 %v465_v46, 0.0 }
  0xed   : > { %v530_v49 = vmax.f32 %v460_v48, 0.0  ;;  %v1973_v50 = vpop.f32.mrb[4].mxu0  ;;  %2200 = vmatpush3.bf16.msra.mxu1 %v2197_v26  ;;  %v2213_v26 = vpack.c.bf16 %v1783_v24, %v1782_v23  ;;  %v1424_v23 = vld [vmem:[%s2623_s6] sm:$0xff]  ;;  %v1425_v24 = vld [vmem:[%s2623_s6 + $0x8] sm:$0xff] }
  0xee   : > { %v475_v52 = vadd.f32 %v1973_v50, %v333_v38  ;;  %v469_v53 = vpop.f32.mrb[5].mxu0  ;;  %2202 = vmatprep.subr.bf16.mxu1 %v2201_v28 }
  0xef   : > { %v470_v54 = vadd.f32 %v469_v53, %v333_v38  ;;  %2000 = vmatprep.mubr.msk.f32.mxu1 %vm334_vm0, %v530_v49  ;;  %2214 = vmatprep.subr.bf16.mxu0 %v2213_v26 }
  0xf0   : > { %2001 = vmatmul.mubr.msk.f32.gmra.mrb[2].mxu1 %vm334_vm0, %v531_v51  ;;  %v533_v57 = vmax.f32 %v475_v52, 0.0 }
  0xf1   : > { %v532_v55 = vmax.f32 %v470_v54, 0.0  ;;  %v1976_v56 = vpop.f32.mrb[6].mxu0  ;;  %2204 = vmatpush3.bf16.msra.mxu1 %v2201_v28  ;;  %v2217_v28 = vpack.c.bf16 %v1785_v27, %v1784_v25  ;;  %v1426_v25 = vld [vmem:[%s2623_s6 + $0x10] sm:$0xff]  ;;  %v1427_v27 = vld [vmem:[%s2623_s6 + $0x18] sm:$0xff] }
  0xf2   : > { %v485_v58 = vadd.f32 %v1976_v56, %v333_v38  ;;  %v479_v59 = vpop.f32.mrb[7].mxu0  ;;  %2206 = vmatprep.subr.bf16.mxu1 %v2205_v31 }
  0xf3   : > { %v480_v60 = vadd.f32 %v479_v59, %v333_v38  ;;  %2003 = vmatprep.mubr.msk.f32.mxu1 %vm334_vm0, %v532_v55 }
  0xf4   : > { %2004 = vmatmul.mubr.msk.f32.gmra.mrb[4].mxu1 %vm334_vm0, %v533_v57  ;;  %v535_v63 = vmax.f32 %v485_v58, 0.0 }
  0xf5   : > { %v534_v61 = vmax.f32 %v480_v60, 0.0  ;;  %v1979_v62 = vpop.f32.mrb[8].mxu0  ;;  %2208 = vmatpush3.bf16.msra.mxu1 %v2205_v31  ;;  %v2221_v31 = vpack.c.bf16 %v1787_v30, %v1786_v29  ;;  %v1428_v29 = vld [vmem:[%s2623_s6 + $0x20] sm:$0xff]  ;;  %v1429_v30 = vld [vmem:[%s2623_s6 + $0x28] sm:$0xff] }
  0xf6   : > { %v495_v0 = vadd.f32 %v1979_v62, %v333_v38  ;;  %v489_v1 = vpop.f32.mrb[9].mxu0  ;;  %2210 = vmatprep.subr.bf16.mxu1 %v2209_v34 }
  0xf7   : > { %v490_v2 = vadd.f32 %v489_v1, %v333_v38  ;;  %2006 = vmatprep.mubr.msk.f32.mxu1 %vm334_vm0, %v534_v61 }
  0xf8   : > { %2007 = vmatmul.mubr.msk.f32.gmra.mrb[6].mxu1 %vm334_vm0, %v535_v63  ;;  %v537_v5 = vmax.f32 %v495_v0, 0.0 }
  0xf9   : > { %v536_v3 = vmax.f32 %v490_v2, 0.0  ;;  %v1982_v4 = vpop.f32.mrb[10].mxu0  ;;  %2212 = vmatpush3.bf16.msra.mxu1 %v2209_v34  ;;  %v2225_v34 = vpack.c.bf16 %v1789_v33, %v1788_v32  ;;  %v1430_v32 = vld [vmem:[%s2623_s6 + $0x30] sm:$0xff]  ;;  %v1431_v33 = vld [vmem:[%s2623_s6 + $0x38] sm:$0xff] }
  0xfa   : > { %v505_v6 = vadd.f32 %v1982_v4, %v333_v38  ;;  %v499_v7 = vpop.f32.mrb[11].mxu0 }
  0xfb   : > { %v500_v8 = vadd.f32 %v499_v7, %v333_v38  ;;  %2009 = vmatprep.mubr.msk.f32.mxu1 %vm334_vm0, %v536_v3 }
  0xfc   : > { %2010 = vmatmul.mubr.msk.f32.gmra.mrb[8].mxu1 %vm334_vm0, %v537_v5  ;;  %v539_v11 = vmax.f32 %v505_v6, 0.0 }
  0xfd   : > { %v538_v9 = vmax.f32 %v500_v8, 0.0  ;;  %v1985_v10 = vpop.f32.mrb[12].mxu0 }
  0xfe   : > { %v515_v12 = vadd.f32 %v1985_v10, %v333_v38  ;;  %v509_v13 = vpop.f32.mrb[13].mxu0 }
  0xff   : > { %v510_v14 = vadd.f32 %v509_v13, %v333_v38  ;;  %2012 = vmatprep.mubr.msk.f32.mxu1 %vm334_vm0, %v538_v9 }
 0x100   : > { %2013 = vmatmul.mubr.msk.f32.gmra.mrb[10].mxu1 %vm334_vm0, %v539_v11  ;;  %v541_v17 = vmax.f32 %v515_v12, 0.0 }
 0x101   : > { %v540_v15 = vmax.f32 %v510_v14, 0.0  ;;  %v1988_v16 = vpop.f32.mrb[14].mxu0 }
 0x102   : > { %v525_v18 = vadd.f32 %v1988_v16, %v333_v38  ;;  %v519_v19 = vpop.f32.mrb[15].mxu0 }
 0x103   : > { %v520_v20 = vadd.f32 %v519_v19, %v333_v38  ;;  %2015 = vmatprep.mubr.msk.f32.mxu1 %vm334_vm0, %v540_v15  ;;  %v551_v38 = vsub.s32 1, %v2392_v35 }
 0x104   : > { %2016 = vmatmul.mubr.msk.f32.gmra.mrb[12].mxu1 %vm334_vm0, %v541_v17  ;;  %v543_v22 = vmax.f32 %v525_v18, 0.0 }
 0x105   : > { %v542_v21 = vmax.f32 %v520_v20, 0.0  ;;  %v552_v39 = vrot.slane %v2398_v37, %v551_v38 }
 0x107   : > { %2018 = vmatprep.mubr.msk.f32.mxu1 %vm334_vm0, %v542_v21 }
 0x108   : > { %2019 = vmatmul.mubr.msk.f32.gmra.mrb[14].mxu1 %vm334_vm0, %v543_v22 }
 0x1bf   : > { %v1999_v40 = vpop.f32.mrb[0].mxu1 }
 0x1c0   : > { %v673_v41 = vadd.f32 %v1999_v40, %v552_v39  ;;  %v667_v42 = vpop.f32.mrb[1].mxu1 }
 0x1c1   : > { %v668_v43 = vadd.f32 %v667_v42, %v552_v39 }
 0x1c2   : > { %v747_v46 = vmax.f32 %v673_v41, 0.0 }
 0x1c3   : > { %v746_v44 = vmax.f32 %v668_v43, 0.0  ;;  %v2002_v45 = vpop.f32.mrb[2].mxu1 }
 0x1c4   : > { %v683_v47 = vadd.f32 %v2002_v45, %v552_v39  ;;  %v677_v48 = vpop.f32.mrb[3].mxu1 }
 0x1c5   : > { %v678_v49 = vadd.f32 %v677_v48, %v552_v39  ;;  %2029 = vmatprep.mubr.msk.f32.mxu0 %vm334_vm0, %v746_v44 }
 0x1c6   : > { %2030 = vmatmul.mubr.msk.f32.vlgmr.msra.gmra.mrb[16].mxu0 %vm334_vm0, %v747_v46  ;;  %v749_v52 = vmax.f32 %v683_v47, 0.0 }
 0x1c7   : > { %v748_v50 = vmax.f32 %v678_v49, 0.0  ;;  %v2005_v51 = vpop.f32.mrb[4].mxu1  ;;  %2216 = vmatpush3.bf16.msra.mxu0 %v2213_v26  ;;  %v2229_v26 = vpack.c.bf16 %v1425_v24, %v1424_v23 }
 0x1c8   : > { %v693_v53 = vadd.f32 %v2005_v51, %v552_v39  ;;  %v687_v54 = vpop.f32.mrb[5].mxu1  ;;  %2218 = vmatprep.subr.bf16.mxu0 %v2217_v28 }
 0x1c9   : > { %v688_v37 = vadd.f32 %v687_v54, %v552_v39  ;;  %2032 = vmatprep.mubr.msk.f32.mxu0 %vm334_vm0, %v748_v50  ;;  %2230 = vmatprep.subr.bf16.mxu1 %v2229_v26 }
 0x1ca   : > { %2033 = vmatmul.mubr.msk.f32.gmra.mrb[18].mxu0 %vm334_vm0, %v749_v52  ;;  %v751_v57 = vmax.f32 %v693_v53, 0.0 }
 0x1cb   : > { %v750_v55 = vmax.f32 %v688_v37, 0.0  ;;  %v2008_v56 = vpop.f32.mrb[6].mxu1  ;;  %2220 = vmatpush3.bf16.msra.mxu0 %v2217_v28  ;;  %v2233_v28 = vpack.c.bf16 %v1427_v27, %v1426_v25 }
 0x1cc   : > { %v703_v58 = vadd.f32 %v2008_v56, %v552_v39  ;;  %v697_v59 = vpop.f32.mrb[7].mxu1  ;;  %2222 = vmatprep.subr.bf16.mxu0 %v2221_v31 }
 0x1cd   : > { %v698_v60 = vadd.f32 %v697_v59, %v552_v39  ;;  %2035 = vmatprep.mubr.msk.f32.mxu0 %vm334_vm0, %v750_v55 }
 0x1ce   : > { %2036 = vmatmul.mubr.msk.f32.gmra.mrb[20].mxu0 %vm334_vm0, %v751_v57  ;;  %v753_v63 = vmax.f32 %v703_v58, 0.0 }
 0x1cf   : > { %v752_v61 = vmax.f32 %v698_v60, 0.0  ;;  %v2011_v62 = vpop.f32.mrb[8].mxu1  ;;  %2224 = vmatpush3.bf16.msra.mxu0 %v2221_v31  ;;  %v2237_v31 = vpack.c.bf16 %v1429_v30, %v1428_v29 }
 0x1d0   : > { %v713_v0 = vadd.f32 %v2011_v62, %v552_v39  ;;  %v707_v1 = vpop.f32.mrb[9].mxu1  ;;  %2226 = vmatprep.subr.bf16.mxu0 %v2225_v34 }
 0x1d1   : > { %v708_v2 = vadd.f32 %v707_v1, %v552_v39  ;;  %2038 = vmatprep.mubr.msk.f32.mxu0 %vm334_vm0, %v752_v61 }
 0x1d2   : > { %2039 = vmatmul.mubr.msk.f32.gmra.mrb[22].mxu0 %vm334_vm0, %v753_v63  ;;  %v755_v5 = vmax.f32 %v713_v0, 0.0 }
 0x1d3   : > { %v754_v3 = vmax.f32 %v708_v2, 0.0  ;;  %v2014_v4 = vpop.f32.mrb[10].mxu1  ;;  %2228 = vmatpush3.bf16.msra.mxu0 %v2225_v34  ;;  %v2241_v34 = vpack.c.bf16 %v1431_v33, %v1430_v32 }
 0x1d4   : > { %v723_v6 = vadd.f32 %v2014_v4, %v552_v39  ;;  %v717_v7 = vpop.f32.mrb[11].mxu1 }
 0x1d5   : > { %v718_v8 = vadd.f32 %v717_v7, %v552_v39  ;;  %2041 = vmatprep.mubr.msk.f32.mxu0 %vm334_vm0, %v754_v3 }
 0x1d6   : > { %2042 = vmatmul.mubr.msk.f32.gmra.mrb[24].mxu0 %vm334_vm0, %v755_v5  ;;  %v757_v11 = vmax.f32 %v723_v6, 0.0 }
 0x1d7   : > { %v756_v9 = vmax.f32 %v718_v8, 0.0  ;;  %v2017_v10 = vpop.f32.mrb[12].mxu1 }
 0x1d8   : > { %v733_v12 = vadd.f32 %v2017_v10, %v552_v39  ;;  %v727_v13 = vpop.f32.mrb[13].mxu1 }
 0x1d9   : > { %v728_v14 = vadd.f32 %v727_v13, %v552_v39  ;;  %2044 = vmatprep.mubr.msk.f32.mxu0 %vm334_vm0, %v756_v9 }
 0x1da   : > { %2045 = vmatmul.mubr.msk.f32.gmra.mrb[26].mxu0 %vm334_vm0, %v757_v11  ;;  %v759_v17 = vmax.f32 %v733_v12, 0.0 }
 0x1db   : > { %v758_v15 = vmax.f32 %v728_v14, 0.0  ;;  %v2020_v16 = vpop.f32.mrb[14].mxu1 }
 0x1dc   : > { %v743_v18 = vadd.f32 %v2020_v16, %v552_v39  ;;  %v737_v19 = vpop.f32.mrb[15].mxu1 }
 0x1dd   : > { %v738_v20 = vadd.f32 %v737_v19, %v552_v39  ;;  %2047 = vmatprep.mubr.msk.f32.mxu0 %vm334_vm0, %v758_v15  ;;  %v2490_v39 = vld [vmem:[%s2622_s5] sm:$0x7] }
 0x1de   : > { %2048 = vmatmul.mubr.msk.f32.gmra.mrb[28].mxu0 %vm334_vm0, %v759_v17  ;;  %v761_v22 = vmax.f32 %v743_v18, 0.0  ;;  %v770_v40 = vrot.slane %v2490_v39, %v332_v36 }
 0x1df   : > { %v760_v21 = vmax.f32 %v738_v20, 0.0 }
 0x1e1   : > { %2050 = vmatprep.mubr.msk.f32.mxu0 %vm334_vm0, %v760_v21 }
 0x1e2   : > { %2051 = vmatmul.mubr.msk.f32.gmra.mrb[30].mxu0 %vm334_vm0, %v761_v22 }
 0x299   : > { %v2031_v41 = vpop.f32.mrb[16].mxu0 }
 0x29a   : > { %v891_v42 = vadd.f32 %v2031_v41, %v770_v40  ;;  %v885_v43 = vpop.f32.mrb[17].mxu0 }
 0x29b   : > { %v886_v44 = vadd.f32 %v885_v43, %v770_v40 }
 0x29c   : > { %v965_v47 = vmax.f32 %v891_v42, 0.0 }
 0x29d   : > { %v964_v45 = vmax.f32 %v886_v44, 0.0  ;;  %v2034_v46 = vpop.f32.mrb[18].mxu0 }
 0x29e   : > { %v901_v48 = vadd.f32 %v2034_v46, %v770_v40  ;;  %v895_v49 = vpop.f32.mrb[19].mxu0 }
 0x29f   : > { %v896_v50 = vadd.f32 %v895_v49, %v770_v40  ;;  %2069 = vmatprep.mubr.msk.f32.mxu1 %vm992_vm1, %v964_v45 }
 0x2a0   : > { %2070 = vmatmul.mubr.msk.f32.vlgmr.msra.gmra.mrb[16].mxu1 %vm992_vm1, %v965_v47  ;;  %v967_v53 = vmax.f32 %v901_v48, 0.0 }
 0x2a1   : > { %v966_v51 = vmax.f32 %v896_v50, 0.0  ;;  %v2037_v52 = vpop.f32.mrb[20].mxu0  ;;  %2232 = vmatpush3.bf16.msra.mxu1 %v2229_v26 }
 0x2a2   : > { %v911_v54 = vadd.f32 %v2037_v52, %v770_v40  ;;  %v905_v36 = vpop.f32.mrb[21].mxu0  ;;  %2234 = vmatprep.subr.bf16.mxu1 %v2233_v28 }
 0x2a3   : > { %v906_v37 = vadd.f32 %v905_v36, %v770_v40  ;;  %2072 = vmatprep.mubr.msk.f32.mxu1 %vm992_vm1, %v966_v51 }
 0x2a4   : > { %2073 = vmatmul.mubr.msk.f32.gmra.mrb[18].mxu1 %vm992_vm1, %v967_v53  ;;  %v969_v57 = vmax.f32 %v911_v54, 0.0 }
 0x2a5   : > { %v968_v55 = vmax.f32 %v906_v37, 0.0  ;;  %v2040_v56 = vpop.f32.mrb[22].mxu0  ;;  %2236 = vmatpush3.bf16.msra.mxu1 %v2233_v28 }
 0x2a6   : > { %v921_v58 = vadd.f32 %v2040_v56, %v770_v40  ;;  %v915_v59 = vpop.f32.mrb[23].mxu0  ;;  %2238 = vmatprep.subr.bf16.mxu1 %v2237_v31 }
 0x2a7   : > { %v916_v60 = vadd.f32 %v915_v59, %v770_v40  ;;  %2075 = vmatprep.mubr.msk.f32.mxu1 %vm992_vm1, %v968_v55 }
 0x2a8   : > { %2076 = vmatmul.mubr.msk.f32.gmra.mrb[20].mxu1 %vm992_vm1, %v969_v57  ;;  %v971_v63 = vmax.f32 %v921_v58, 0.0 }
 0x2a9   : > { %v970_v61 = vmax.f32 %v916_v60, 0.0  ;;  %v2043_v62 = vpop.f32.mrb[24].mxu0  ;;  %2240 = vmatpush3.bf16.msra.mxu1 %v2237_v31 }
 0x2aa   : > { %v931_v0 = vadd.f32 %v2043_v62, %v770_v40  ;;  %v925_v1 = vpop.f32.mrb[25].mxu0  ;;  %2242 = vmatprep.subr.bf16.mxu1 %v2241_v34 }
 0x2ab   : > { %v926_v2 = vadd.f32 %v925_v1, %v770_v40  ;;  %2078 = vmatprep.mubr.msk.f32.mxu1 %vm992_vm1, %v970_v61 }
 0x2ac   : > { %2079 = vmatmul.mubr.msk.f32.gmra.mrb[22].mxu1 %vm992_vm1, %v971_v63  ;;  %v973_v5 = vmax.f32 %v931_v0, 0.0 }
 0x2ad   : > { %v972_v3 = vmax.f32 %v926_v2, 0.0  ;;  %v2046_v4 = vpop.f32.mrb[26].mxu0  ;;  %2244 = vmatpush3.bf16.msra.mxu1 %v2241_v34 }
 0x2ae   : > { %v941_v6 = vadd.f32 %v2046_v4, %v770_v40  ;;  %v935_v7 = vpop.f32.mrb[27].mxu0 }
 0x2af   : > { %v936_v8 = vadd.f32 %v935_v7, %v770_v40  ;;  %2081 = vmatprep.mubr.msk.f32.mxu1 %vm992_vm1, %v972_v3 }
 0x2b0   : > { %2082 = vmatmul.mubr.msk.f32.gmra.mrb[24].mxu1 %vm992_vm1, %v973_v5  ;;  %v975_v11 = vmax.f32 %v941_v6, 0.0 }
 0x2b1   : > { %v974_v9 = vmax.f32 %v936_v8, 0.0  ;;  %v2049_v10 = vpop.f32.mrb[28].mxu0 }
 0x2b2   : > { %v951_v12 = vadd.f32 %v2049_v10, %v770_v40  ;;  %v945_v13 = vpop.f32.mrb[29].mxu0 }
 0x2b3   : > { %v946_v14 = vadd.f32 %v945_v13, %v770_v40  ;;  %2084 = vmatprep.mubr.msk.f32.mxu1 %vm992_vm1, %v974_v9 }
 0x2b4   : > { %2085 = vmatmul.mubr.msk.f32.gmra.mrb[26].mxu1 %vm992_vm1, %v975_v11  ;;  %v977_v17 = vmax.f32 %v951_v12, 0.0 }
 0x2b5   : > { %v976_v15 = vmax.f32 %v946_v14, 0.0  ;;  %v2052_v16 = vpop.f32.mrb[30].mxu0 }
 0x2b6   : > { %v961_v18 = vadd.f32 %v2052_v16, %v770_v40  ;;  %v955_v19 = vpop.f32.mrb[31].mxu0 }
 0x2b7   : > { %v956_v20 = vadd.f32 %v955_v19, %v770_v40  ;;  %2087 = vmatprep.mubr.msk.f32.mxu1 %vm992_vm1, %v976_v15  ;;  %v991_v40 = vrot.slane %v2490_v39, %v551_v38 }
 0x2b8   : > { %2088 = vmatmul.mubr.msk.f32.gmra.mrb[28].mxu1 %vm992_vm1, %v977_v17  ;;  %v979_v22 = vmax.f32 %v961_v18, 0.0 }
 0x2b9   : > { %v978_v21 = vmax.f32 %v956_v20, 0.0 }
 0x2bb   : > { %2090 = vmatprep.mubr.msk.f32.mxu1 %vm992_vm1, %v978_v21 }
 0x2bc   : > { %2091 = vmatmul.mubr.msk.f32.gmra.mrb[30].mxu1 %vm992_vm1, %v979_v22  ;;  %v1213_v22 = vsub.s32 2, %v2392_v35 }
 0x2be   : > { %v1214_v23 = vrot.slane %v2490_v39, %v1213_v22 }
 0x373   : > { %v2071_v41 = vpop.f32.mrb[16].mxu1 }
 0x374   : > { %v1113_v42 = vadd.f32 %v2071_v41, %v991_v40  ;;  %v1107_v43 = vpop.f32.mrb[17].mxu1 }
 0x375   : > { %v1108_v44 = vadd.f32 %v1107_v43, %v991_v40 }
 0x376   : > { %v1187_v47 = vmax.f32 %v1113_v42, 0.0 }
 0x377   : > { %v1186_v45 = vmax.f32 %v1108_v44, 0.0  ;;  %v2074_v46 = vpop.f32.mrb[18].mxu1 }
 0x378   : > { %v1123_v48 = vadd.f32 %v2074_v46, %v991_v40  ;;  %v1117_v49 = vpop.f32.mrb[19].mxu1 }
 0x379   : > { %v1118_v50 = vadd.f32 %v1117_v49, %v991_v40  ;;  %2109 = vmatprep.mubr.msk.f32.mxu0 %vm992_vm1, %v1186_v45 }
 0x37a   : > { %2110 = vmatmul.mubr.msk.f32.vlgmr.msra.gmra.mrb[32].mxu0 %vm992_vm1, %v1187_v47  ;;  %v1189_v53 = vmax.f32 %v1123_v48, 0.0 }
 0x37b   : > { %v1188_v51 = vmax.f32 %v1118_v50, 0.0  ;;  %v2077_v52 = vpop.f32.mrb[20].mxu1 }
 0x37c   : > { %v1133_v54 = vadd.f32 %v2077_v52, %v991_v40  ;;  %v1127_v36 = vpop.f32.mrb[21].mxu1 }
 0x37d   : > { %v1128_v38 = vadd.f32 %v1127_v36, %v991_v40  ;;  %2112 = vmatprep.mubr.msk.f32.mxu0 %vm992_vm1, %v1188_v51 }
 0x37e   : > { %2113 = vmatmul.mubr.msk.f32.gmra.mrb[34].mxu0 %vm992_vm1, %v1189_v53  ;;  %v1191_v56 = vmax.f32 %v1133_v54, 0.0 }
 0x37f   : > { %v1190_v37 = vmax.f32 %v1128_v38, 0.0  ;;  %v2080_v55 = vpop.f32.mrb[22].mxu1 }
 0x380   : > { %v1143_v57 = vadd.f32 %v2080_v55, %v991_v40  ;;  %v1137_v58 = vpop.f32.mrb[23].mxu1 }
 0x381   : > { %v1138_v59 = vadd.f32 %v1137_v58, %v991_v40  ;;  %2115 = vmatprep.mubr.msk.f32.mxu0 %vm992_vm1, %v1190_v37 }
 0x382   : > { %2116 = vmatmul.mubr.msk.f32.gmra.mrb[36].mxu0 %vm992_vm1, %v1191_v56  ;;  %v1193_v62 = vmax.f32 %v1143_v57, 0.0 }
 0x383   : > { %v1192_v60 = vmax.f32 %v1138_v59, 0.0  ;;  %v2083_v61 = vpop.f32.mrb[24].mxu1 }
 0x384   : > { %v1153_v63 = vadd.f32 %v2083_v61, %v991_v40  ;;  %v1147_v0 = vpop.f32.mrb[25].mxu1 }
 0x385   : > { %v1148_v1 = vadd.f32 %v1147_v0, %v991_v40  ;;  %2118 = vmatprep.mubr.msk.f32.mxu0 %vm992_vm1, %v1192_v60 }
 0x386   : > { %2119 = vmatmul.mubr.msk.f32.gmra.mrb[38].mxu0 %vm992_vm1, %v1193_v62  ;;  %v1195_v4 = vmax.f32 %v1153_v63, 0.0 }
 0x387   : > { %v1194_v2 = vmax.f32 %v1148_v1, 0.0  ;;  %v2086_v3 = vpop.f32.mrb[26].mxu1 }
 0x388   : > { %v1163_v5 = vadd.f32 %v2086_v3, %v991_v40  ;;  %v1157_v6 = vpop.f32.mrb[27].mxu1 }
 0x389   : > { %v1158_v7 = vadd.f32 %v1157_v6, %v991_v40  ;;  %2121 = vmatprep.mubr.msk.f32.mxu0 %vm992_vm1, %v1194_v2 }
 0x38a   : > { %2122 = vmatmul.mubr.msk.f32.gmra.mrb[40].mxu0 %vm992_vm1, %v1195_v4  ;;  %v1197_v10 = vmax.f32 %v1163_v5, 0.0 }
 0x38b   : > { %v1196_v8 = vmax.f32 %v1158_v7, 0.0  ;;  %v2089_v9 = vpop.f32.mrb[28].mxu1 }
 0x38c   : > { %v1173_v11 = vadd.f32 %v2089_v9, %v991_v40  ;;  %v1167_v12 = vpop.f32.mrb[29].mxu1 }
 0x38d   : > { %v1168_v13 = vadd.f32 %v1167_v12, %v991_v40  ;;  %2124 = vmatprep.mubr.msk.f32.mxu0 %vm992_vm1, %v1196_v8  ;;  %v1806_v8 = vld [vmem:[%s2624_s7] ss:$0 sm:$0xff] }
 0x38e   : > { %2125 = vmatmul.mubr.msk.f32.gmra.mrb[42].mxu0 %vm992_vm1, %v1197_v10  ;;  %v1199_v16 = vmax.f32 %v1173_v11, 0.0 }
 0x38f   : > { %v1198_v14 = vmax.f32 %v1168_v13, 0.0  ;;  %v2092_v15 = vpop.f32.mrb[30].mxu1 }
 0x390   : > { %v1183_v17 = vadd.f32 %v2092_v15, %v991_v40  ;;  %v1177_v18 = vpop.f32.mrb[31].mxu1 }
 0x391   : > { %v1178_v19 = vadd.f32 %v1177_v18, %v991_v40  ;;  %2127 = vmatprep.mubr.msk.f32.mxu0 %vm992_vm1, %v1198_v14 }
 0x392   : > { %2128 = vmatmul.mubr.msk.f32.gmra.mrb[44].mxu0 %vm992_vm1, %v1199_v16  ;;  %v1201_v21 = vmax.f32 %v1183_v17, 0.0 }
 0x393   : > { %v1200_v20 = vmax.f32 %v1178_v19, 0.0 }
 0x395   : > { %2130 = vmatprep.mubr.msk.f32.mxu0 %vm992_vm1, %v1200_v20 }
 0x396   : > { %2131 = vmatmul.mubr.msk.f32.gmra.mrb[46].mxu0 %vm992_vm1, %v1201_v21 }
 0x44d   : > { %v2111_v24 = vpop.f32.mrb[32].mxu0 }
 0x44e   : > { %v1335_v25 = vadd.f32 %v2111_v24, %v1214_v23  ;;  %v1329_v26 = vpop.f32.mrb[33].mxu0 }
 0x44f   : > { %v1330_v27 = vadd.f32 %v1329_v26, %v1214_v23 }
 0x450   : > { %v1409_v30 = vmax.f32 %v1335_v25, 0.0 }
 0x451   : > { %v1408_v28 = vmax.f32 %v1330_v27, 0.0  ;;  %v2114_v29 = vpop.f32.mrb[34].mxu0 }
 0x452   : > { %v1345_v31 = vadd.f32 %v2114_v29, %v1214_v23  ;;  %v1339_v32 = vpop.f32.mrb[35].mxu0 }
 0x453   : > { %v1340_v33 = vadd.f32 %v1339_v32, %v1214_v23  ;;  %2149 = vmatprep.mubr.msk.f32.mxu1 %vm992_vm1, %v1408_v28 }
 0x454   : > { %2150 = vmatmul.mubr.msk.f32.vlgmr.msra.gmra.mrb[32].mxu1 %vm992_vm1, %v1409_v30  ;;  %v1411_v41 = vmax.f32 %v1345_v31, 0.0 }
 0x455   : > { %v1410_v34 = vmax.f32 %v1340_v33, 0.0  ;;  %v2117_v40 = vpop.f32.mrb[36].mxu0 }
 0x456   : > { %v1355_v35 = vadd.f32 %v2117_v40, %v1214_v23  ;;  %v1349_v42 = vpop.f32.mrb[37].mxu0 }
 0x457   : > { %v1350_v39 = vadd.f32 %v1349_v42, %v1214_v23  ;;  %2152 = vmatprep.mubr.msk.f32.mxu1 %vm992_vm1, %v1410_v34 }
 0x458   : > { %2153 = vmatmul.mubr.msk.f32.gmra.mrb[34].mxu1 %vm992_vm1, %v1411_v41  ;;  %v1413_v45 = vmax.f32 %v1355_v35, 0.0 }
 0x459   : > { %v1412_v43 = vmax.f32 %v1350_v39, 0.0  ;;  %v2120_v44 = vpop.f32.mrb[38].mxu0 }
 0x45a   : > { %v1365_v46 = vadd.f32 %v2120_v44, %v1214_v23  ;;  %v1359_v47 = vpop.f32.mrb[39].mxu0 }
 0x45b   : > { %v1360_v48 = vadd.f32 %v1359_v47, %v1214_v23  ;;  %2155 = vmatprep.mubr.msk.f32.mxu1 %vm992_vm1, %v1412_v43 }
 0x45c   : > { %2156 = vmatmul.mubr.msk.f32.gmra.mrb[36].mxu1 %vm992_vm1, %v1413_v45  ;;  %v1415_v51 = vmax.f32 %v1365_v46, 0.0 }
 0x45d   : > { %v1414_v49 = vmax.f32 %v1360_v48, 0.0  ;;  %v2123_v50 = vpop.f32.mrb[40].mxu0 }
 0x45e   : > { %v1375_v52 = vadd.f32 %v2123_v50, %v1214_v23  ;;  %v1369_v53 = vpop.f32.mrb[41].mxu0 }
 0x45f   : > { %v1370_v54 = vadd.f32 %v1369_v53, %v1214_v23  ;;  %2158 = vmatprep.mubr.msk.f32.mxu1 %vm992_vm1, %v1414_v49 }
 0x460   : > { %2159 = vmatmul.mubr.msk.f32.gmra.mrb[38].mxu1 %vm992_vm1, %v1415_v51  ;;  %v1417_v37 = vmax.f32 %v1375_v52, 0.0 }
 0x461   : > { %v1416_v36 = vmax.f32 %v1370_v54, 0.0  ;;  %v2126_v38 = vpop.f32.mrb[42].mxu0 }
 0x462   : > { %v1385_v55 = vadd.f32 %v2126_v38, %v1214_v23  ;;  %v1379_v56 = vpop.f32.mrb[43].mxu0 }
 0x463   : > { %v1380_v57 = vadd.f32 %v1379_v56, %v1214_v23  ;;  %2161 = vmatprep.mubr.msk.f32.mxu1 %vm992_vm1, %v1416_v36 }
 0x464   : > { %2162 = vmatmul.mubr.msk.f32.gmra.mrb[40].mxu1 %vm992_vm1, %v1417_v37  ;;  %v1419_v60 = vmax.f32 %v1385_v55, 0.0 }
 0x465   : > { %v1418_v58 = vmax.f32 %v1380_v57, 0.0  ;;  %v2129_v59 = vpop.f32.mrb[44].mxu0 }
 0x466   : > { %v1395_v61 = vadd.f32 %v2129_v59, %v1214_v23  ;;  %v1389_v62 = vpop.f32.mrb[45].mxu0 }
 0x467   : > { %v1390_v63 = vadd.f32 %v1389_v62, %v1214_v23  ;;  %2164 = vmatprep.mubr.msk.f32.mxu1 %vm992_vm1, %v1418_v58 }
 0x468   : > { %2165 = vmatmul.mubr.msk.f32.gmra.mrb[42].mxu1 %vm992_vm1, %v1419_v60  ;;  %v1421_v2 = vmax.f32 %v1395_v61, 0.0 }
 0x469   : > { %v1420_v0 = vmax.f32 %v1390_v63, 0.0  ;;  %v2132_v1 = vpop.f32.mrb[46].mxu0 }
 0x46a   : > { %v1405_v3 = vadd.f32 %v2132_v1, %v1214_v23  ;;  %v1399_v4 = vpop.f32.mrb[47].mxu0 }
 0x46b   : > { %v1400_v5 = vadd.f32 %v1399_v4, %v1214_v23  ;;  %2167 = vmatprep.mubr.msk.f32.mxu1 %vm992_vm1, %v1420_v0 }
 0x46c   : > { %2168 = vmatmul.mubr.msk.f32.gmra.mrb[44].mxu1 %vm992_vm1, %v1421_v2  ;;  %v1423_v7 = vmax.f32 %v1405_v3, 0.0 }
 0x46d   : > { %v1422_v6 = vmax.f32 %v1400_v5, 0.0 }
 0x46f   : > { %2170 = vmatprep.mubr.msk.f32.mxu1 %vm992_vm1, %v1422_v6 }
 0x470   : > { %2171 = vmatmul.mubr.msk.f32.gmra.mrb[46].mxu1 %vm992_vm1, %v1423_v7 }
 0x527   : > { %v2151_v9 = vpop.f32.mrb[32].mxu1 }
 0x528   : > { %v1559_v10 = vadd.f32 %v2151_v9, %v1806_v8  ;;  %v1553_v11 = vpop.f32.mrb[33].mxu1 }
 0x529   : > { %v1554_v12 = vadd.f32 %v1806_v8, %v1553_v11 }
 0x52a   : > { %1634 = vst.msk [vmem:[%s2580_s15 + $0x8] sm:$0xff] %vm1632_vm2, %v1559_v10 }
 0x52b   : > { %1633 = vst.msk [vmem:[%s2580_s15] sm:$0xff] %vm1632_vm2, %v1554_v12  ;;  %v2154_v13 = vpop.f32.mrb[34].mxu1 }
 0x52c   : > { %v1569_v14 = vadd.f32 %v2154_v13, %v1806_v8  ;;  %v1563_v15 = vpop.f32.mrb[35].mxu1 }
 0x52d   : > { %v1564_v16 = vadd.f32 %v1806_v8, %v1563_v15 }
 0x52e   : > { %1636 = vst.msk [vmem:[%s2580_s15 + $0x18] sm:$0xff] %vm1632_vm2, %v1569_v14 }
 0x52f   : > { %1635 = vst.msk [vmem:[%s2580_s15 + $0x10] sm:$0xff] %vm1632_vm2, %v1564_v16  ;;  %v2157_v17 = vpop.f32.mrb[36].mxu1 }
 0x530   : > { %v1579_v18 = vadd.f32 %v2157_v17, %v1806_v8  ;;  %v1573_v19 = vpop.f32.mrb[37].mxu1 }
 0x531   : > { %v1574_v20 = vadd.f32 %v1806_v8, %v1573_v19 }
 0x532   : > { %1638 = vst.msk [vmem:[%s2580_s15 + $0x28] sm:$0xff] %vm1632_vm2, %v1579_v18 }
 0x533   : > { %1637 = vst.msk [vmem:[%s2580_s15 + $0x20] sm:$0xff] %vm1632_vm2, %v1574_v20  ;;  %v2160_v21 = vpop.f32.mrb[38].mxu1 }
 0x534   : > { %v1589_v22 = vadd.f32 %v2160_v21, %v1806_v8  ;;  %v1583_v23 = vpop.f32.mrb[39].mxu1 }
 0x535   : > { %v1584_v24 = vadd.f32 %v1806_v8, %v1583_v23 }
 0x536   : > { %1640 = vst.msk [vmem:[%s2580_s15 + $0x38] sm:$0xff] %vm1632_vm2, %v1589_v22 }
 0x537   : > { %1639 = vst.msk [vmem:[%s2580_s15 + $0x30] sm:$0xff] %vm1632_vm2, %v1584_v24  ;;  %v2163_v25 = vpop.f32.mrb[40].mxu1 }
 0x538   : > { %v1599_v26 = vadd.f32 %v2163_v25, %v1806_v8  ;;  %v1593_v27 = vpop.f32.mrb[41].mxu1 }
 0x539   : > { %v1594_v28 = vadd.f32 %v1806_v8, %v1593_v27 }
 0x53a   : > { %1642 = vst.msk [vmem:[%s2580_s15 + $0x48] sm:$0xff] %vm1632_vm2, %v1599_v26 }
 0x53b   : > { %1641 = vst.msk [vmem:[%s2580_s15 + $0x40] sm:$0xff] %vm1632_vm2, %v1594_v28  ;;  %v2166_v29 = vpop.f32.mrb[42].mxu1 }
 0x53c   : > { %v1609_v30 = vadd.f32 %v2166_v29, %v1806_v8  ;;  %v1603_v31 = vpop.f32.mrb[43].mxu1 }
 0x53d   : > { %v1604_v32 = vadd.f32 %v1806_v8, %v1603_v31 }
 0x53e   : > { %1644 = vst.msk [vmem:[%s2580_s15 + $0x58] sm:$0xff] %vm1632_vm2, %v1609_v30 }
 0x53f   : > { %1643 = vst.msk [vmem:[%s2580_s15 + $0x50] sm:$0xff] %vm1632_vm2, %v1604_v32  ;;  %v2169_v33 = vpop.f32.mrb[44].mxu1 }
 0x540   : > { %v1619_v34 = vadd.f32 %v2169_v33, %v1806_v8  ;;  %v1613_v40 = vpop.f32.mrb[45].mxu1 }
 0x541   : > { %v1614_v41 = vadd.f32 %v1806_v8, %v1613_v40 }
 0x542   : > { %1646 = vst.msk [vmem:[%s2580_s15 + $0x68] sm:$0xff] %vm1632_vm2, %v1619_v34 }
 0x543   : > { %1645 = vst.msk [vmem:[%s2580_s15 + $0x60] sm:$0xff] %vm1632_vm2, %v1614_v41  ;;  %v2172_v35 = vpop.f32.mrb[46].mxu1 }
 0x544   : > { %v1629_v42 = vadd.f32 %v2172_v35, %v1806_v8  ;;  %v1623_v39 = vpop.f32.mrb[47].mxu1 }
 0x545   : > { %v1624_v43 = vadd.f32 %v1806_v8, %v1623_v39 }
 0x546   : > { %1648 = vst.msk [vmem:[%s2580_s15 + $0x78] sm:$0xff] %vm1632_vm2, %v1629_v42 }
 0x547   : > { %1647 = vst.msk [vmem:[%s2580_s15 + $0x70] sm:$0xff] %vm1632_vm2, %v1624_v43 }
 0x548 PF: > { %s18_s27 = sadd.s32 1, %s2259_s27  }
 0x549   : > { %p15_p4 = scmp.ge.s32.totalorder %s18_s27, 4  }
 0x54b   :  { %17 = sbr.rel (!%p15_p4) target bundleno = 1 (0x1), region = 84 }

</bundles_post_ra>
